<compile_context>
chip_gen: v6e
topology: v6e:2x2x1
jax: 0.10.0
libtpu: 0.0.40
codegen_flags: <defaults>
</compile_context>

<pallas_src>
import functools

import jax
import jax.numpy as jnp
from jax.experimental import pallas as pl
from jax.experimental.pallas import tpu as pltpu


def _ffn_kernel(x_ref, w1_ref, b1_ref, w2_ref, b2_ref, o_ref, acc_ref):
    """One (row-tile, hidden-tile) step of: relu(x @ W1 + b1) @ W2 + b2."""
    k = pl.program_id(1)

    @pl.when(k == 0)
    def _init():
        # Fold the output bias into the accumulator init: removes one
        # (tm, E) f32 add + broadcast from the finalize epilogue.
        acc_ref[...] = jnp.broadcast_to(
            b2_ref[...].astype(jnp.float32), acc_ref.shape)

    # First linear (MXU, native dtype operands, f32 accumulation) + bias + ReLU.
    h = jnp.dot(x_ref[...], w1_ref[...], preferred_element_type=jnp.float32)
    h = jnp.maximum(h + b1_ref[...].astype(jnp.float32), 0.0)

    # TODO(synk): training-mode dropout (p=0.1) would be applied to `h` here.

    # Second linear: cast h back to the weight dtype for a bf16-native matmul,
    # accumulate the hidden-dim partial product into the f32 VMEM scratch.
    acc_ref[...] += jnp.dot(h.astype(w2_ref.dtype), w2_ref[...],
                            preferred_element_type=jnp.float32)

    @pl.when(k == pl.num_programs(1) - 1)
    def _finalize():
        o_ref[...] = acc_ref[...].astype(o_ref.dtype)


def _round_up(v, m):
    return ((v + m - 1) // m) * m


def _round_down_mult8(v):
    return max(8, (v // 8) * 8)


def _vmem_capacity_bytes():
    """Best-effort per-core VMEM capacity query (trace-time, Python ints)."""
    try:
        cap = getattr(pltpu.get_tpu_info(), "vmem_capacity_bytes", None)
        if cap:
            return int(cap)
    except Exception:
        pass
    try:
        kind = jax.devices()[0].device_kind.lower()
        if "v5" in kind or "v6" in kind:
            return 128 * 1024 * 1024
    except Exception:
        pass
    return 64 * 1024 * 1024  # conservative default (v7x / unknown parts)


@functools.partial(jax.jit, static_argnames=("tm", "tk"))
def ffn_forward(x, w1, b1, w2, b2, *, tm=1024, tk=512):
    """x: (B, T, n_embd).  Returns (B, T, n_embd)."""
    B, T, n_embd = x.shape
    n_hddn = w1.shape[1]
    M = B * T
    x2 = x.reshape(M, n_embd)

    # --- lane-dense feature dim: pad E to a multiple of 128 -----------------
    E = n_embd if n_embd % 128 == 0 else _round_up(n_embd, 128)
    if E != n_embd:
        pe = E - n_embd
        x2 = jnp.pad(x2, ((0, 0), (0, pe)))
        w1 = jnp.pad(w1, ((0, pe), (0, 0)))
        w2 = jnp.pad(w2, ((0, 0), (0, pe)))
        b2 = jnp.pad(b2, ((0, 0), (0, pe)))

    # --- row tile ------------------------------------------------------------
    tm = min(tm, M)
    if tm < M and tm % 8 != 0:
        tm = _round_down_mult8(tm)
    # Megacore (v7x): keep >= 2 row tiles when M is large so both TCs get work.
    if M >= 512 and pl.cdiv(M, tm) < 2:
        tm = _round_up(pl.cdiv(M, 2), 8)

    # --- hidden tile: largest multiple-of-128 divisor of n_hddn <= request ---
    tk_cands = [d for d in range(128, n_hddn + 1, 128) if n_hddn % d == 0]
    if not tk_cands:
        tk_cands = [n_hddn]          # n_hddn not a multiple of 128: full dim
    fits = [d for d in tk_cands if d <= tk]
    tk = max(fits) if fits else min(tk_cands)

    # --- per-chip VMEM budgeting ---------------------------------------------
    itx = x2.dtype.itemsize
    itw = w1.dtype.itemsize
    ito = x.dtype.itemsize

    def footprint(tm_, tk_):
        return (tm_ * E * 4                        # f32 accumulator scratch
                + 2 * tm_ * E * itx                # x tile, double buffered
                + 2 * tm_ * E * ito                # out tile, double buffered
                + 2 * (E * tk_ + tk_) * itw        # W1 + b1, double buffered
                + 2 * (tk_ * E + E) * itw          # W2 + b2, double buffered
                + tm_ * tk_ * 4)                   # f32 h intermediate

    vmem_cap = _vmem_capacity_bytes()
    vmem_limit = min(100 * 1024 * 1024,
                     max(32 * 1024 * 1024, vmem_cap - 16 * 1024 * 1024))
    budget = vmem_limit - 4 * 1024 * 1024
    while footprint(tm, tk) > budget:
        smaller_tk = [d for d in tk_cands if d < tk]
        if smaller_tk:                 # shrink tk first (keeps tm / intensity)
            tk = max(smaller_tk)
            continue
        new_tm = _round_down_mult8(tm // 2)
        if new_tm >= tm:
            break
        tm = new_tm

    grid = (pl.cdiv(M, tm), n_hddn // tk)

    # Advisory cost hint: weights are re-streamed once per row tile.
    flops = 2 * M * E * n_hddn * 2
    bytes_accessed = (
        x2.size * itx
        + grid[0] * (w1.size * itw + w2.size * itw)
        + b1.size * b1.dtype.itemsize + b2.size * b2.dtype.itemsize
        + M * E * ito)
    cost = pl.CostEstimate(flops=flops, transcendentals=0,
                           bytes_accessed=bytes_accessed)

    out2 = pl.pallas_call(
        _ffn_kernel,
        out_shape=jax.ShapeDtypeStruct((M, E), x.dtype),
        grid_spec=pltpu.PrefetchScalarGridSpec(
            num_scalar_prefetch=0,
            grid=grid,
            in_specs=[
                # row tile of the input (same block across all hidden steps)
                pl.BlockSpec((tm, E), lambda i, k: (i, 0)),
                # hidden-dim tiles of the weights / first bias
                pl.BlockSpec((E, tk), lambda i, k: (0, k)),
                pl.BlockSpec((1, tk), lambda i, k: (0, k)),
                pl.BlockSpec((tk, E), lambda i, k: (k, 0)),
                # second bias: resident, constant block
                pl.BlockSpec((1, E), lambda i, k: (0, 0)),
            ],
            out_specs=pl.BlockSpec((tm, E), lambda i, k: (i, 0)),
            scratch_shapes=[pltpu.VMEM((tm, E), jnp.float32)],
        ),
        compiler_params=pltpu.CompilerParams(
            dimension_semantics=("parallel", "arbitrary"),
            vmem_limit_bytes=vmem_limit,
        ),
        cost_estimate=cost,
    )(x2, w1, b1, w2, b2)

    if E != n_embd:
        out2 = out2[:, :n_embd]
    return out2.reshape(B, T, n_embd)


def init_ffn_params(key, n_embd, n_hddn, dtype=jnp.float32):
    """nn.Linear-style init: U(-1/sqrt(fan_in), 1/sqrt(fan_in)).

    Weights are (in_features, out_features) so the kernel computes x @ W.
    """
    k1, k2, k3, k4 = jax.random.split(key, 4)
    bound1 = 1.0 / (n_embd ** 0.5)
    bound2 = 1.0 / (n_hddn ** 0.5)
    w1 = jax.random.uniform(k1, (n_embd, n_hddn), dtype, -bound1, bound1)
    b1 = jax.random.uniform(k2, (1, n_hddn), dtype, -bound1, bound1)
    w2 = jax.random.uniform(k3, (n_hddn, n_embd), dtype, -bound2, bound2)
    b2 = jax.random.uniform(k4, (1, n_embd), dtype, -bound2, bound2)
    return w1, b1, w2, b2


def _reference(x2, w1, b1, w2, b2):
    h = jnp.maximum(x2 @ w1 + b1, 0.0)
    return h @ w2 + b2


if __name__ == "__main__":
    # --- small f32 check (B=2, T=8, n_embd=32, n_hddn=64) -------------------
    # Exercises the feature-dim padding path (32 -> 128 lanes).
    B, T, n_embd, n_hddn = 2, 8, 32, 64
    key = jax.random.PRNGKey(0)
    kx, kp = jax.random.split(key)
    x = jax.random.normal(kx, (B, T, n_embd), jnp.float32)
    w1, b1, w2, b2 = init_ffn_params(kp, n_embd, n_hddn)

    out = jax.block_until_ready(ffn_forward(x, w1, b1, w2, b2))
    ref = _reference(x.reshape(-1, n_embd), w1, b1, w2, b2).reshape(B, T, n_embd)
    assert out.shape == (B, T, n_embd)
    assert jnp.allclose(out, ref, atol=1e-5, rtol=1e-5)

    # --- bf16 check exercising the multi-tile grid (2 row x 4 hidden tiles) -
    B2, T2, E2, H2 = 2, 256, 128, 512
    kx2, kp2 = jax.random.split(jax.random.PRNGKey(1))
    xb = jax.random.normal(kx2, (B2, T2, E2), jnp.float32).astype(jnp.bfloat16)
    p = init_ffn_params(kp2, E2, H2, dtype=jnp.bfloat16)
    out_b = jax.block_until_ready(ffn_forward(xb, *p, tm=256, tk=128))
    ref_b = _reference(xb.astype(jnp.float32).reshape(-1, E2),
                       *(a.astype(jnp.float32) for a in p)).reshape(B2, T2, E2)
    assert out_b.shape == (B2, T2, E2)
    assert jnp.allclose(out_b.astype(jnp.float32), ref_b, atol=1e-1, rtol=1e-1)

    print("KERNEL_OK")
</pallas_src>

<mosaic_0001>
module attributes {stable_mosaic.version = 11 : i64} {
  func.func @_ffn_kernel(%arg0: i32, %arg1: i32, %arg2: memref<16x128xf32, #tpu.memory_space<vmem>>, %arg3: memref<128x64xf32, #tpu.memory_space<vmem>>, %arg4: memref<1x64xf32, #tpu.memory_space<vmem>>, %arg5: memref<64x128xf32, #tpu.memory_space<vmem>>, %arg6: memref<1x128xf32, #tpu.memory_space<vmem>>, %arg7: memref<16x128xf32, #tpu.memory_space<vmem>>, %arg8: memref<16x128xf32, #tpu.memory_space<vmem>>) attributes {dimension_semantics = [#tpu.dimension_semantics<parallel>, #tpu.dimension_semantics<arbitrary>], iteration_bounds = array<i64: 1, 1>, scalar_prefetch = 0 : i64, scratch_operands = 1 : i64, tpu.core_type = #tpu.core_type<tc>, window_params = [{transform_indices = @transform_0, window_bounds = array<i64: 16, 128>}, {transform_indices = @transform_1, window_bounds = array<i64: 128, 64>}, {transform_indices = @transform_2, window_bounds = array<i64: 1, 64>}, {transform_indices = @transform_3, window_bounds = array<i64: 64, 128>}, {pipeline_mode = #tpu.pipeline_mode<synchronous>, transform_indices = @transform_4, window_bounds = array<i64: 1, 128>}, {transform_indices = @transform_5, window_bounds = array<i64: 16, 128>}]} {
    %c0_i32 = arith.constant 0 : i32
    %0 = arith.cmpi eq, %arg1, %c0_i32 : i32
    %1 = arith.extui %0 : i1 to i32
    %c0_i32_0 = arith.constant 0 : i32
    %2 = arith.cmpi ne, %1, %c0_i32_0 : i32
    scf.if %2 {
      %c0_16 = arith.constant 0 : index
      %c0_17 = arith.constant 0 : index
      %19 = vector.load %arg6[%c0_16, %c0_17] : memref<1x128xf32, #tpu.memory_space<vmem>>, vector<1x128xf32>
      %20 = vector.shape_cast %19 : vector<1x128xf32> to vector<1x128xf32>
      %21 = vector.broadcast %20 : vector<1x128xf32> to vector<16x128xf32>
      %c0_18 = arith.constant 0 : index
      %c0_19 = arith.constant 0 : index
      %22 = vector.load %arg8[%c0_18, %c0_19] : memref<16x128xf32, #tpu.memory_space<vmem>>, vector<16x128xf32>
      tpu.vector_store %arg8[%c0_18, %c0_19], %21 {strides = array<i32>} : memref<16x128xf32, #tpu.memory_space<vmem>>, vector<16x128xf32>,
    } else {
    }
    %c0 = arith.constant 0 : index
    %c0_1 = arith.constant 0 : index
    %3 = vector.load %arg2[%c0, %c0_1] : memref<16x128xf32, #tpu.memory_space<vmem>>, vector<16x128xf32>
    %c0_2 = arith.constant 0 : index
    %c0_3 = arith.constant 0 : index
    %4 = vector.load %arg3[%c0_2, %c0_3] : memref<128x64xf32, #tpu.memory_space<vmem>>, vector<128x64xf32>
    %cst = arith.constant dense<0.000000e+00> : vector<16x64xf32>
    %5 = tpu.matmul %3, %4, %cst {dimension_numbers = #tpu.dot_dimension_numbers<[1], [0], [0], [1], [0, 0, 1, 1], [], []>} : vector<16x128xf32>, vector<128x64xf32>, vector<16x64xf32> -> vector<16x64xf32>
    %c0_4 = arith.constant 0 : index
    %c0_5 = arith.constant 0 : index
    %6 = vector.load %arg4[%c0_4, %c0_5] : memref<1x64xf32, #tpu.memory_space<vmem>>, vector<1x64xf32>
    %7 = vector.broadcast %6 : vector<1x64xf32> to vector<16x64xf32>
    %8 = arith.addf %5, %7 : vector<16x64xf32>
    %cst_6 = arith.constant 0.000000e+00 : f32
    %9 = vector.broadcast %cst_6 : f32 to vector<16x64xf32>
    %10 = arith.maximumf %8, %9 : vector<16x64xf32>
    %c0_7 = arith.constant 0 : index
    %c0_8 = arith.constant 0 : index
    %11 = vector.load %arg8[%c0_7, %c0_8] : memref<16x128xf32, #tpu.memory_space<vmem>>, vector<16x128xf32>
    %c0_9 = arith.constant 0 : index
    %c0_10 = arith.constant 0 : index
    %12 = vector.load %arg5[%c0_9, %c0_10] : memref<64x128xf32, #tpu.memory_space<vmem>>, vector<64x128xf32>
    %cst_11 = arith.constant dense<0.000000e+00> : vector<16x128xf32>
    %13 = tpu.matmul %10, %12, %cst_11 {dimension_numbers = #tpu.dot_dimension_numbers<[1], [0], [0], [1], [0, 0, 1, 1], [], []>} : vector<16x64xf32>, vector<64x128xf32>, vector<16x128xf32> -> vector<16x128xf32>
    %14 = arith.addf %11, %13 : vector<16x128xf32>
    %c0_12 = arith.constant 0 : index
    %c0_13 = arith.constant 0 : index
    %15 = vector.load %arg8[%c0_12, %c0_13] : memref<16x128xf32, #tpu.memory_space<vmem>>, vector<16x128xf32>
    tpu.vector_store %arg8[%c0_12, %c0_13], %14 {strides = array<i32>} : memref<16x128xf32, #tpu.memory_space<vmem>>, vector<16x128xf32>,
    %c0_i32_14 = arith.constant 0 : i32
    %16 = arith.cmpi eq, %arg1, %c0_i32_14 : i32
    %17 = arith.extui %16 : i1 to i32
    %c0_i32_15 = arith.constant 0 : i32
    %18 = arith.cmpi ne, %17, %c0_i32_15 : i32
    scf.if %18 {
      %c0_16 = arith.constant 0 : index
      %c0_17 = arith.constant 0 : index
      %19 = vector.load %arg8[%c0_16, %c0_17] : memref<16x128xf32, #tpu.memory_space<vmem>>, vector<16x128xf32>
      %c0_18 = arith.constant 0 : index
      %c0_19 = arith.constant 0 : index
      %20 = vector.load %arg7[%c0_18, %c0_19] : memref<16x128xf32, #tpu.memory_space<vmem>>, vector<16x128xf32>
      tpu.vector_store %arg7[%c0_18, %c0_19], %19 {strides = array<i32>} : memref<16x128xf32, #tpu.memory_space<vmem>>, vector<16x128xf32>,
    } else {
    }
    return
  }
  func.func @transform_0(%arg0: i32, %arg1: i32) -> (i32, i32) {
    %c0_i32 = arith.constant 0 : i32
    %c0_i32_0 = arith.constant 0 : i32
    return %arg0, %c0_i32 : i32, i32
  }
  func.func @transform_1(%arg0: i32, %arg1: i32) -> (i32, i32) {
    %c0_i32 = arith.constant 0 : i32
    %c0_i32_0 = arith.constant 0 : i32
    return %c0_i32, %arg1 : i32, i32
  }
  func.func @transform_2(%arg0: i32, %arg1: i32) -> (i32, i32) {
    %c0_i32 = arith.constant 0 : i32
    %c0_i32_0 = arith.constant 0 : i32
    return %c0_i32, %arg1 : i32, i32
  }
  func.func @transform_3(%arg0: i32, %arg1: i32) -> (i32, i32) {
    %c0_i32 = arith.constant 0 : i32
    %c0_i32_0 = arith.constant 0 : i32
    return %arg1, %c0_i32 : i32, i32
  }
  func.func @transform_4(%arg0: i32, %arg1: i32) -> (i32, i32) {
    %c0_i32 = arith.constant 0 : i32
    %c0_i32_0 = arith.constant 0 : i32
    %c0_i32_1 = arith.constant 0 : i32
    return %c0_i32, %c0_i32_0 : i32, i32
  }
  func.func @transform_5(%arg0: i32, %arg1: i32) -> (i32, i32) {
    %c0_i32 = arith.constant 0 : i32
    %c0_i32_0 = arith.constant 0 : i32
    return %arg0, %c0_i32 : i32, i32
  }
}

</mosaic_0001>

<bundles_post_ra>
// kernel: ffn_forward.1
= control target key start
LH: loop header
LB: loop body
LE: loop exit
PB: predicated region body
PF: predicated region fallthrough
CT: control target
= control target key end

     0   :  { %vm145_vm0 = vcmask 523264   ;;  %s448_s1 = inlined_call_operand.vmem [shape: f32[128,64], index: 1, kind: input, shape index: {}]   ;;  %s449_s0 = inlined_call_operand.vmem [shape: f32[16,128], index: 0, kind: input, shape index: {}]   ;;  %s450_s3 = inlined_call_operand.vmem [shape: f32[64,128], index: 3, kind: input, shape index: {}]   ;;  %s451_s2 = inlined_call_operand.vmem [shape: f32[1,64], index: 2, kind: input, shape index: {}]   ;;  %s452_s4 = inlined_call_operand.vmem [shape: f32[1,128], index: 4, kind: input, shape index: {}]   ;;  %s453_s5 = inlined_call_operand.vmem [shape: f32[16,128], index: 5, kind: output, shape index: {}]  }
   0x1   :  { %v50_v0 = vld [vmem:[%s448_s1 + $0x78] sm:$0xff]  ;;  %v49_v1 = vld [vmem:[%s448_s1 + $0x70] sm:$0xff]  ;;  %v48_v2 = vld [vmem:[%s448_s1 + $0x68] sm:$0xff] }
   0x2   :  { %274 = vmatprep.subr.mxu0 %v50_v0  ;;  %v47_v3 = vld [vmem:[%s448_s1 + $0x60] sm:$0xff]  ;;  %v46_v5 = vld [vmem:[%s448_s1 + $0x58] sm:$0xff]  ;;  %v143_v7 = vld [vmem:[%s450_s3 + $0x30] sm:$0xff] }
   0x3   :  { %275 = vmatpush3.msra.mxu0 %v50_v0  ;;  %v33_v4 = vld [vmem:[%s449_s0] sm:$0xff]  ;;  %v144_v6 = vld [vmem:[%s450_s3 + $0x38] sm:$0xff]  ;;  %v45_v8 = vld [vmem:[%s448_s1 + $0x50] sm:$0xff] }
   0x4   :  { %276 = vmatprep.subr.mxu0 %v49_v1  ;;  %306 = vmatprep.mubr.f32.mxu0 %v33_v4  ;;  %v142_v9 = vld [vmem:[%s450_s3 + $0x28] sm:$0xff]  ;;  %v141_v11 = vld [vmem:[%s450_s3 + $0x20] sm:$0xff]  ;;  %v42_v13 = vld [vmem:[%s448_s1 + $0x38] sm:$0xff] }
   0x5   :  { %277 = vmatpush3.msra.mxu0 %v49_v1  ;;  %309 = vmatprep.subr.mxu1 %v144_v6  ;;  %v44_v10 = vld [vmem:[%s448_s1 + $0x48] sm:$0xff]  ;;  %v43_v12 = vld [vmem:[%s448_s1 + $0x40] sm:$0xff]  ;;  %v41_v14 = vld [vmem:[%s448_s1 + $0x30] sm:$0xff] }
   0x6   :  { %278 = vmatprep.subr.mxu0 %v48_v2  ;;  %310 = vmatpush3.msra.mxu1 %v144_v6  ;;  %v40_v15 = vld [vmem:[%s448_s1 + $0x28] sm:$0xff]  ;;  %v39_v16 = vld [vmem:[%s448_s1 + $0x20] sm:$0xff]  ;;  %v38_v17 = vld [vmem:[%s448_s1 + $0x18] sm:$0xff] }
   0x7   :  { %279 = vmatpush3.msra.mxu0 %v48_v2  ;;  %311 = vmatprep.subr.mxu1 %v143_v7  ;;  %v37_v18 = vld [vmem:[%s448_s1 + $0x10] sm:$0xff]  ;;  %v36_v19 = vld [vmem:[%s448_s1 + $0x8] sm:$0xff]  ;;  %v35_v20 = vld [vmem:[%s448_s1] sm:$0xff] }
   0x8   :  { %280 = vmatprep.subr.mxu0 %v47_v3  ;;  %312 = vmatpush3.msra.mxu1 %v143_v7  ;;  %v34_v21 = vld [vmem:[%s449_s0 + $0x8] sm:$0xff]  ;;  %v140_v22 = vld [vmem:[%s450_s3 + $0x18] sm:$0xff]  ;;  %v139_v23 = vld [vmem:[%s450_s3 + $0x10] sm:$0xff] }
   0x9   :  { %281 = vmatpush3.msra.mxu0 %v47_v3  ;;  %313 = vmatprep.subr.mxu1 %v142_v9  ;;  %v138_v24 = vld [vmem:[%s450_s3 + $0x8] sm:$0xff]  ;;  %v137_v25 = vld [vmem:[%s450_s3] sm:$0xff] }
   0xa   :  { %282 = vmatprep.subr.mxu0 %v46_v5  ;;  %314 = vmatpush3.msra.mxu1 %v142_v9  ;;  %v243_v26 = vld [vmem:[%s451_s2] ss:$0 sm:$0xff] }
   0xb   :  { %283 = vmatpush3.msra.mxu0 %v46_v5  ;;  %315 = vmatprep.subr.mxu1 %v141_v11  ;;  %v242_v33 = vld [vmem:[%s452_s4] ss:$0 sm:$0xff] }
   0xc   :  { %284 = vmatprep.subr.mxu0 %v45_v8  ;;  %316 = vmatpush3.msra.mxu1 %v141_v11 }
   0xd   :  { %285 = vmatpush3.msra.mxu0 %v45_v8  ;;  %317 = vmatprep.subr.mxu1 %v140_v22 }
   0xe   :  { %286 = vmatprep.subr.mxu0 %v44_v10  ;;  %318 = vmatpush3.msra.mxu1 %v140_v22 }
   0xf   :  { %287 = vmatpush3.msra.mxu0 %v44_v10  ;;  %319 = vmatprep.subr.mxu1 %v139_v23 }
  0x10   :  { %288 = vmatprep.subr.mxu0 %v43_v12  ;;  %320 = vmatpush3.msra.mxu1 %v139_v23 }
  0x11   :  { %289 = vmatpush3.msra.mxu0 %v43_v12  ;;  %321 = vmatprep.subr.mxu1 %v138_v24 }
  0x12   :  { %290 = vmatprep.subr.mxu0 %v42_v13  ;;  %322 = vmatpush3.msra.mxu1 %v138_v24 }
  0x13   :  { %291 = vmatpush3.msra.mxu0 %v42_v13  ;;  %323 = vmatprep.subr.mxu1 %v137_v25 }
  0x14   :  { %292 = vmatprep.subr.mxu0 %v41_v14  ;;  %324 = vmatpush3.msra.mxu1 %v137_v25 }
  0x15   :  { %293 = vmatpush3.msra.mxu0 %v41_v14 }
  0x16   :  { %294 = vmatprep.subr.mxu0 %v40_v15 }
  0x17   :  { %295 = vmatpush3.msra.mxu0 %v40_v15 }
  0x18   :  { %296 = vmatprep.subr.mxu0 %v39_v16 }
  0x19   :  { %297 = vmatpush3.msra.mxu0 %v39_v16 }
  0x1a   :  { %298 = vmatprep.subr.mxu0 %v38_v17 }
  0x1b   :  { %299 = vmatpush3.msra.mxu0 %v38_v17 }
  0x1c   :  { %300 = vmatprep.subr.mxu0 %v37_v18 }
  0x1d   :  { %301 = vmatpush3.msra.mxu0 %v37_v18 }
  0x1e   :  { %302 = vmatprep.subr.mxu0 %v36_v19 }
  0x1f   :  { %303 = vmatpush3.msra.mxu0 %v36_v19 }
  0x20   :  { %304 = vmatprep.subr.mxu0 %v35_v20 }
  0x21   :  { %305 = vmatpush3.msra.mxu0 %v35_v20 }
  0x22   :  { %307 = vmatmul.mubr.f32.vlgmr.msra.gmra.mxu0 %v34_v21 }
  0xe2   :  { %v308_v27 = vpop.f32.mrf.mxu0 }
  0xe3   :  { %v130_v28 = vadd.f32 %v308_v27, %v243_v26 }
  0xe4   :  { %v124_v29 = vpop.f32.mrf.mxu0 }
  0xe5   :  { %v125_v30 = vadd.f32 %v243_v26, %v124_v29  ;;  %v134_v32 = vmax.f32 %v130_v28, 0.0 }
  0xe7   :  { %v133_v31 = vmax.f32 %v125_v30, 0.0 }
  0xe9   :  { %325 = vmatprep.mubr.msk.f32.mxu1 %vm145_vm0, %v133_v31 }
  0xea   :  { %326 = vmatmul.mubr.msk.f32.vlgmr.msra.gmra.mxu1 %vm145_vm0, %v134_v32 }
 0x1aa   :  { %v327_v34 = vpop.f32.mrf.mxu1 }
 0x1ab   :  { %v228_v35 = vadd.f32 %v327_v34, %v242_v33 }
 0x1ac   :  { %v218_v36 = vpop.f32.mrf.mxu1 }
 0x1ad   :  { %237 = vst [vmem:[%s453_s5 + $0x8] sm:$0xff] %v228_v35  ;;  %v227_v37 = vadd.f32 %v242_v33, %v218_v36 }
 0x1af   :  { %236 = vst [vmem:[%s453_s5] sm:$0xff] %v227_v37 }

</bundles_post_ra>
